<compile_context>
chip_gen: v7x
topology: tpu7x:2x2x1
jax: 0.10.0
libtpu: 0.0.40
codegen_flags: <defaults>
</compile_context>

<pallas_src>
import jax
import jax.numpy as jnp
from jax import lax
from jax.experimental import pallas as pl
from jax.experimental.pallas import tpu as pltpu


def _edge_decoder_kernel(row_ref, col_ref, zsrc_t_ref, zdst_t_ref,
                         w1t_ref, b1_ref, w2_ref, b2_ref, o_ref):
    # row/col : (1, tile_e) int32 (lane-dense)
    # zsrc_t  : (F, N_src)  zdst_t : (F, N_dst)   -- VMEM-resident, transposed
    # w1t     : (H, F)   b1 : (H, 1)   w2 : (1, H)   b2 : (1,) scalar in SMEM
    # o       : (1, tile_e) lane-dense output row
    n_src = zsrc_t_ref.shape[1]
    n_dst = zdst_t_ref.shape[1]
    te = row_ref.shape[1]

    row = row_ref[...]                                    # (1, te)
    col = col_ref[...]

    # Fused gather: exact one-hot @ table on the MXU.  The one-hot is built
    # directly in the (N, te) transposed layout from the lane-dense indices,
    # so no sublane transpose is needed.  precision=HIGHEST keeps the f32
    # table rows exact through the MXU (each output column is 1.0 * one row).
    iota_s = lax.broadcasted_iota(jnp.int32, (n_src, te), 0)
    iota_d = iota_s if n_dst == n_src else lax.broadcasted_iota(
        jnp.int32, (n_dst, te), 0)
    oh_s = (iota_s == row).astype(jnp.float32)            # (n_src, te)
    oh_d = (iota_d == col).astype(jnp.float32)            # (n_dst, te)

    z_src_t = jnp.dot(zsrc_t_ref[...], oh_s,
                      preferred_element_type=jnp.float32,
                      precision=lax.Precision.HIGHEST)    # (F, te)
    z_dst_t = jnp.dot(zdst_t_ref[...], oh_d,
                      preferred_element_type=jnp.float32,
                      precision=lax.Precision.HIGHEST)    # (F, te)

    z_t = z_src_t * z_dst_t                               # (F, te)

    # lin1 + relu, in transposed layout: (H, F) @ (F, te) -> (H, te).
    # TODO(synk): cast z_t / w1t to bf16 (f32 accumulation) at production F/H.
    h_t = jnp.dot(w1t_ref[...], z_t, preferred_element_type=jnp.float32)
    h_t = jnp.maximum(h_t + b1_ref[...], 0.0)             # b1 is (H, 1)

    # lin2: (1, H) @ (H, te) -> lane-dense (1, te); no transposed feed,
    # no masked single-lane column stores.
    o = jnp.dot(w2_ref[...], h_t, preferred_element_type=jnp.float32)
    o_ref[...] = (o + b2_ref[0]).astype(o_ref.dtype)


def _round_up(x, m):
    return ((x + m - 1) // m) * m


def _tpu_vmem_and_cores():
    """Best-effort generation query: per-TensorCore VMEM bytes and TC count.
    Falls back to conservative v7x-like numbers (64 MiB, 2 TCs) if the query
    or its attribute names are unavailable."""
    vmem = None
    cores = None
    try:
        info = pltpu.get_tpu_info()
        for name in ("vmem_capacity_bytes", "vmem_bytes", "vmem_size_bytes"):
            v = getattr(info, name, None)
            if v:
                vmem = int(v)
                break
        for name in ("num_tensorcores", "tensorcores_per_chip", "num_cores",
                     "cores_per_chip"):
            c = getattr(info, name, None)
            if c:
                cores = int(c)
                break
    except Exception:
        pass
    if vmem is None:
        vmem = 64 * 1024 * 1024
    if cores is None:
        cores = 2
    return vmem, cores


def _vmem_estimate_bytes(te, n_src, n_dst, F, H):
    """Rough VMEM footprint of one grid step (f32), including the (N, te)
    one-hot intermediates that cap tile size for larger node tables."""
    f32 = 4
    r8 = lambda x: _round_up(max(x, 1), 8)
    r128 = lambda x: _round_up(max(x, 1), 128)
    resident = (r8(F) * r128(n_src) + r8(F) * r128(n_dst)     # tables^T (Buffered(1))
                + r8(H) * r128(F) + r8(H) * r128(1)           # W1^T, b1
                + r8(1) * r128(H)) * f32                      # W2 row
    per_tile = (2 * 2 * r8(1) * te                            # row/col, double-buffered
                + 2 * r8(1) * te) * f32                       # output, double-buffered
    transient = ((r8(n_src) + r8(n_dst)) * te                 # one-hots
                 + (3 * r8(F) + r8(H)) * te) * f32            # z_src_t, z_dst_t, z_t, h_t
    return resident + per_tile + transient


def _choose_tile_e(E, requested, n_src, n_dst, F, H, vmem_budget, min_steps):
    """Large tiles to amortize ~0.35us/step grid overhead; keep >= min_steps
    grid steps only on multi-TC chips; shrink until the VMEM estimate fits."""
    te = _round_up(max(128, min(int(requested), 8192)), 128)
    te = min(te, _round_up(E, 128))                 # never bigger than the problem
    if min_steps > 1 and E > 128 * min_steps:       # >= 2 steps only for megacore
        te = min(te, _round_up(pl.cdiv(E, min_steps), 128))
    while te > 128 and _vmem_estimate_bytes(te, n_src, n_dst, F, H) > vmem_budget:
        te -= 128
    return max(te, 128)


def edge_decoder_pallas(row, col, z_src_table, z_dst_table, w1, b1, w2, b2,
                        *, tile_e=4096):
    """row/col: (E,) integer indices into the node tables.
    z_*_table: (N, F) float node embeddings (VMEM-resident inside the kernel).
    w1: (F, H)  b1: (H,)  w2: (H, 1)  b2: (1,).  Returns (E,) float32."""
    E = int(row.shape[0])
    n_src, F = z_src_table.shape
    n_dst = z_dst_table.shape[0]
    H = w1.shape[1]

    # Layout plumbing (not compute hoisting): tiny one-off transposes so every
    # in-kernel matmul is canonical (M,K)@(K,N) and the output is lane-dense.
    zsrc_t = z_src_table.astype(jnp.float32).T            # (F, n_src)
    zdst_t = z_dst_table.astype(jnp.float32).T            # (F, n_dst)
    w1_t = w1.astype(jnp.float32).T                       # (H, F)
    b1_c = b1.astype(jnp.float32).reshape(H, 1)           # (H, 1)
    w2_r = w2.astype(jnp.float32).reshape(1, H)           # (1, H)
    b2_s = b2.astype(jnp.float32).reshape(1)              # (1,) scalar -> SMEM

    # Generation-aware tile / VMEM policy.
    vmem_bytes, n_tc = _tpu_vmem_and_cores()
    vmem_limit = int(min((vmem_bytes * 3) // 4, 96 * 1024 * 1024))  # ~48M v7x / ~96M v5e,v6e
    min_steps = 2 if n_tc >= 2 else 1
    te = _choose_tile_e(E, tile_e, n_src, n_dst, F, H,
                        vmem_budget=(vmem_limit * 2) // 3, min_steps=min_steps)

    E_pad = _round_up(E, te)
    pad = E_pad - E
    # Pad with index 0 (a valid row); the padded outputs are sliced off below.
    row1 = jnp.pad(row.astype(jnp.int32), (0, pad)).reshape(1, E_pad)
    col1 = jnp.pad(col.astype(jnp.int32), (0, pad)).reshape(1, E_pad)

    grid = (E_pad // te,)
    resident = dict(pipeline_mode=pl.Buffered(1))   # grid-invariant: single-buffer

    out = pl.pallas_call(
        _edge_decoder_kernel,
        out_shape=jax.ShapeDtypeStruct((1, E_pad), jnp.float32),
        grid_spec=pltpu.PrefetchScalarGridSpec(
            num_scalar_prefetch=0,
            grid=grid,
            in_specs=[
                pl.BlockSpec((1, te), lambda i: (0, i)),                 # row idx (lane-dense)
                pl.BlockSpec((1, te), lambda i: (0, i)),                 # col idx (lane-dense)
                pl.BlockSpec((F, n_src), lambda i: (0, 0), **resident),  # src table^T
                pl.BlockSpec((F, n_dst), lambda i: (0, 0), **resident),  # dst table^T
                pl.BlockSpec((H, F), lambda i: (0, 0), **resident),      # W1^T
                pl.BlockSpec((H, 1), lambda i: (0, 0), **resident),      # b1 column
                pl.BlockSpec((1, H), lambda i: (0, 0), **resident),      # W2 row
                pl.BlockSpec(memory_space=pltpu.MemorySpace.SMEM),       # b2 scalar
            ],
            out_specs=pl.BlockSpec((1, te), lambda i: (0, i)),           # lane-dense row
        ),
        compiler_params=pltpu.CompilerParams(
            dimension_semantics=("parallel",),
            vmem_limit_bytes=vmem_limit),
    )(row1, col1, zsrc_t, zdst_t, w1_t, b1_c, w2_r, b2_s)
    return out.reshape(-1)[:E]


class EdgeDecoderPallas:
    """JAX/Pallas re-implementation of the PyTorch EdgeDecoder module."""

    def __init__(self, in_channels, hidden_channels, key):
        k1, k2, k3, k4 = jax.random.split(key, 4)
        lim1 = (6.0 / (in_channels + hidden_channels)) ** 0.5
        lim2 = (6.0 / (hidden_channels + 1)) ** 0.5
        self.w1 = jax.random.uniform(k1, (in_channels, hidden_channels),
                                     jnp.float32, -lim1, lim1)
        self.b1 = jax.random.uniform(k3, (hidden_channels,),
                                     jnp.float32, -lim1, lim1)
        self.w2 = jax.random.uniform(k2, (hidden_channels, 1),
                                     jnp.float32, -lim2, lim2)
        self.b2 = jax.random.uniform(k4, (1,), jnp.float32, -lim2, lim2)

    def __call__(self, z_dict, edge_label_index, edge_type):
        row, col = edge_label_index[0], edge_label_index[1]
        src_type = edge_type[0]
        dst_type = edge_type[-1]
        return edge_decoder_pallas(row, col, z_dict[src_type], z_dict[dst_type],
                                   self.w1, self.b1, self.w2, self.b2)


def _reference(z_dict, edge_label_index, edge_type, dec):
    row, col = edge_label_index[0], edge_label_index[1]
    z = z_dict[edge_type[0]][row] * z_dict[edge_type[-1]][col]
    h = jnp.maximum(z @ dec.w1 + dec.b1, 0.0)
    return (h @ dec.w2 + dec.b2).reshape(-1)


if __name__ == "__main__":
    key = jax.random.PRNGKey(0)
    k_u, k_m, k_r, k_c, k_w = jax.random.split(key, 5)

    F = 32          # node embedding dim (lin1 in_channels, inferred from z)
    H = 32          # hidden_channels
    N_user, N_movie = 10, 12
    E = 1000        # deliberately NOT a tile multiple: exercises padding path

    z_dict = {
        "user":  jax.random.normal(k_u, (N_user, F), jnp.float32),
        "movie": jax.random.normal(k_m, (N_movie, F), jnp.float32),
    }
    row = jax.random.randint(k_r, (E,), 0, N_user)
    col = jax.random.randint(k_c, (E,), 0, N_movie)
    edge_label_index = jnp.stack([row, col], axis=0)
    edge_type = ("user", "rates", "movie")

    decoder = EdgeDecoderPallas(in_channels=F, hidden_channels=H, key=k_w)

    out = decoder(z_dict, edge_label_index, edge_type)
    out = jax.block_until_ready(out)
    assert out.shape == (E,)

    ref = _reference(z_dict, edge_label_index, edge_type, decoder)
    assert jnp.allclose(out, ref, atol=1e-5, rtol=1e-5), "mismatch vs reference"

    print("KERNEL_OK")
</pallas_src>

<mosaic_0001>
module attributes {stable_mosaic.version = 11 : i64} {
  func.func @_edge_decoder_kernel(%arg0: i32, %arg1: memref<1x512xi32, #tpu.memory_space<vmem>>, %arg2: memref<1x512xi32, #tpu.memory_space<vmem>>, %arg3: memref<32x10xf32, #tpu.memory_space<vmem>>, %arg4: memref<32x12xf32, #tpu.memory_space<vmem>>, %arg5: memref<32x32xf32, #tpu.memory_space<vmem>>, %arg6: memref<32x1xf32, #tpu.memory_space<vmem>>, %arg7: memref<1x32xf32, #tpu.memory_space<vmem>>, %arg8: memref<1xf32, #tpu.memory_space<smem>>, %arg9: memref<1x512xf32, #tpu.memory_space<vmem>>) attributes {dimension_semantics = [#tpu.dimension_semantics<parallel>], iteration_bounds = array<i64: 2>, scalar_prefetch = 0 : i64, scratch_operands = 0 : i64, tpu.core_type = #tpu.core_type<tc>, window_params = [{transform_indices = @transform_0, window_bounds = array<i64: 1, 512>}, {transform_indices = @transform_1, window_bounds = array<i64: 1, 512>}, {pipeline_mode = #tpu.pipeline_mode<synchronous>, transform_indices = @transform_2, window_bounds = array<i64: 32, 10>}, {pipeline_mode = #tpu.pipeline_mode<synchronous>, transform_indices = @transform_3, window_bounds = array<i64: 32, 12>}, {pipeline_mode = #tpu.pipeline_mode<synchronous>, transform_indices = @transform_4, window_bounds = array<i64: 32, 32>}, {pipeline_mode = #tpu.pipeline_mode<synchronous>, transform_indices = @transform_5, window_bounds = array<i64: 32, 1>}, {pipeline_mode = #tpu.pipeline_mode<synchronous>, transform_indices = @transform_6, window_bounds = array<i64: 1, 32>}, {transform_indices = @transform_7, window_bounds = array<i64: 1>}, {transform_indices = @transform_8, window_bounds = array<i64: 1, 512>}]} {
    %c0 = arith.constant 0 : index
    %c0_0 = arith.constant 0 : index
    %0 = vector.load %arg1[%c0, %c0_0] : memref<1x512xi32, #tpu.memory_space<vmem>>, vector<1x512xi32>
    %c0_1 = arith.constant 0 : index
    %c0_2 = arith.constant 0 : index
    %1 = vector.load %arg2[%c0_1, %c0_2] : memref<1x512xi32, #tpu.memory_space<vmem>>, vector<1x512xi32>
    %2 = tpu.iota {dimensions = array<i32: 0>} : vector<10x512xi32>
    %3 = tpu.iota {dimensions = array<i32: 0>} : vector<12x512xi32>
    %4 = vector.broadcast %0 : vector<1x512xi32> to vector<10x512xi32>
    %5 = arith.cmpi eq, %2, %4 : vector<10x512xi32>
    %6 = arith.extui %5 : vector<10x512xi1> to vector<10x512xi32>
    %7 = arith.sitofp %6 : vector<10x512xi32> to vector<10x512xf32>
    %8 = vector.broadcast %1 : vector<1x512xi32> to vector<12x512xi32>
    %9 = arith.cmpi eq, %3, %8 : vector<12x512xi32>
    %10 = arith.extui %9 : vector<12x512xi1> to vector<12x512xi32>
    %11 = arith.sitofp %10 : vector<12x512xi32> to vector<12x512xf32>
    %c0_3 = arith.constant 0 : index
    %c0_4 = arith.constant 0 : index
    %12 = vector.load %arg3[%c0_3, %c0_4] : memref<32x10xf32, #tpu.memory_space<vmem>>, vector<32x10xf32>
    %cst = arith.constant dense<0.000000e+00> : vector<32x512xf32>
    %13 = tpu.matmul %12, %7, %cst {dimension_numbers = #tpu.dot_dimension_numbers<[1], [0], [0], [1], [0, 0, 1, 1], [], []>, precision = #tpu.contract_precision<fp32>} : vector<32x10xf32>, vector<10x512xf32>, vector<32x512xf32> -> vector<32x512xf32>
    %c0_5 = arith.constant 0 : index
    %c0_6 = arith.constant 0 : index
    %14 = vector.load %arg4[%c0_5, %c0_6] : memref<32x12xf32, #tpu.memory_space<vmem>>, vector<32x12xf32>
    %cst_7 = arith.constant dense<0.000000e+00> : vector<32x512xf32>
    %15 = tpu.matmul %14, %11, %cst_7 {dimension_numbers = #tpu.dot_dimension_numbers<[1], [0], [0], [1], [0, 0, 1, 1], [], []>, precision = #tpu.contract_precision<fp32>} : vector<32x12xf32>, vector<12x512xf32>, vector<32x512xf32> -> vector<32x512xf32>
    %16 = arith.mulf %13, %15 : vector<32x512xf32>
    %c0_8 = arith.constant 0 : index
    %c0_9 = arith.constant 0 : index
    %17 = vector.load %arg5[%c0_8, %c0_9] : memref<32x32xf32, #tpu.memory_space<vmem>>, vector<32x32xf32>
    %cst_10 = arith.constant dense<0.000000e+00> : vector<32x512xf32>
    %18 = tpu.matmul %17, %16, %cst_10 {dimension_numbers = #tpu.dot_dimension_numbers<[1], [0], [0], [1], [0, 0, 1, 1], [], []>} : vector<32x32xf32>, vector<32x512xf32>, vector<32x512xf32> -> vector<32x512xf32>
    %c0_11 = arith.constant 0 : index
    %c0_12 = arith.constant 0 : index
    %19 = vector.load %arg6[%c0_11, %c0_12] : memref<32x1xf32, #tpu.memory_space<vmem>>, vector<32x1xf32>
    %20 = vector.broadcast %19 : vector<32x1xf32> to vector<32x512xf32>
    %21 = arith.addf %18, %20 : vector<32x512xf32>
    %cst_13 = arith.constant 0.000000e+00 : f32
    %22 = vector.broadcast %cst_13 : f32 to vector<32x512xf32>
    %23 = arith.maximumf %21, %22 : vector<32x512xf32>
    %c0_14 = arith.constant 0 : index
    %c0_15 = arith.constant 0 : index
    %24 = vector.load %arg7[%c0_14, %c0_15] : memref<1x32xf32, #tpu.memory_space<vmem>>, vector<1x32xf32>
    %cst_16 = arith.constant dense<0.000000e+00> : vector<1x512xf32>
    %25 = tpu.matmul %24, %23, %cst_16 {dimension_numbers = #tpu.dot_dimension_numbers<[1], [0], [0], [1], [0, 0, 1, 1], [], []>} : vector<1x32xf32>, vector<32x512xf32>, vector<1x512xf32> -> vector<1x512xf32>
    %c0_17 = arith.constant 0 : index
    %26 = memref.load %arg8[%c0_17] : memref<1xf32, #tpu.memory_space<smem>>
    %27 = vector.broadcast %26 : f32 to vector<1x512xf32>
    %28 = arith.addf %25, %27 : vector<1x512xf32>
    %c0_18 = arith.constant 0 : index
    %c0_19 = arith.constant 0 : index
    %29 = vector.load %arg9[%c0_18, %c0_19] : memref<1x512xf32, #tpu.memory_space<vmem>>, vector<1x512xf32>
    tpu.vector_store %arg9[%c0_18, %c0_19], %28 {strides = array<i32>} : memref<1x512xf32, #tpu.memory_space<vmem>>, vector<1x512xf32>,
    return
  }
  func.func @transform_0(%arg0: i32) -> (i32, i32) {
    %c0_i32 = arith.constant 0 : i32
    %c0_i32_0 = arith.constant 0 : i32
    return %c0_i32, %arg0 : i32, i32
  }
  func.func @transform_1(%arg0: i32) -> (i32, i32) {
    %c0_i32 = arith.constant 0 : i32
    %c0_i32_0 = arith.constant 0 : i32
    return %c0_i32, %arg0 : i32, i32
  }
  func.func @transform_2(%arg0: i32) -> (i32, i32) {
    %c0_i32 = arith.constant 0 : i32
    %c0_i32_0 = arith.constant 0 : i32
    %c0_i32_1 = arith.constant 0 : i32
    return %c0_i32, %c0_i32_0 : i32, i32
  }
  func.func @transform_3(%arg0: i32) -> (i32, i32) {
    %c0_i32 = arith.constant 0 : i32
    %c0_i32_0 = arith.constant 0 : i32
    %c0_i32_1 = arith.constant 0 : i32
    return %c0_i32, %c0_i32_0 : i32, i32
  }
  func.func @transform_4(%arg0: i32) -> (i32, i32) {
    %c0_i32 = arith.constant 0 : i32
    %c0_i32_0 = arith.constant 0 : i32
    %c0_i32_1 = arith.constant 0 : i32
    return %c0_i32, %c0_i32_0 : i32, i32
  }
  func.func @transform_5(%arg0: i32) -> (i32, i32) {
    %c0_i32 = arith.constant 0 : i32
    %c0_i32_0 = arith.constant 0 : i32
    %c0_i32_1 = arith.constant 0 : i32
    return %c0_i32, %c0_i32_0 : i32, i32
  }
  func.func @transform_6(%arg0: i32) -> (i32, i32) {
    %c0_i32 = arith.constant 0 : i32
    %c0_i32_0 = arith.constant 0 : i32
    %c0_i32_1 = arith.constant 0 : i32
    return %c0_i32, %c0_i32_0 : i32, i32
  }
  func.func @transform_7(%arg0: i32) -> i32 {
    %c0_i32 = arith.constant 0 : i32
    %c0_i32_0 = arith.constant 0 : i32
    return %c0_i32 : i32
  }
  func.func @transform_8(%arg0: i32) -> (i32, i32) {
    %c0_i32 = arith.constant 0 : i32
    %c0_i32_0 = arith.constant 0 : i32
    return %c0_i32, %arg0 : i32, i32
  }
}

</mosaic_0001>

<bundles_post_ra>
// kernel: tpu_custom_call.1
= control target key start
LH: loop header
LB: loop body
LE: loop exit
PB: predicated region body
PF: predicated region fallthrough
CT: control target
= control target key end

     0   :  { %s4924_s0 = inlined_call_operand.vmem [shape: s32[1,1024], index: 0, kind: input, shape index: {}]   ;;  %s4925_s1 = inlined_call_operand.vmem [shape: s32[1,1024], index: 1, kind: input, shape index: {}]   ;;  %s4926_s2 = inlined_call_operand.vmem [shape: f32[32,10], index: 2, kind: input, shape index: {}]   ;;  %s4927_s3 = inlined_call_operand.vmem [shape: f32[32,12], index: 3, kind: input, shape index: {}]   ;;  %s4928_s4 = inlined_call_operand.vmem [shape: f32[32,32], index: 4, kind: input, shape index: {}]   ;;  %s4929_s5 = inlined_call_operand.vmem [shape: f32[32,1], index: 5, kind: input, shape index: {}]   ;;  %s4930_s6 = inlined_call_operand.vmem [shape: f32[1,32], index: 6, kind: input, shape index: {}]   ;;  %s4931_s7 = inlined_call_operand.<no memory space> [shape: f32[1], index: 7, kind: input, shape index: {}]   ;;  %s4932_s8 = inlined_call_operand.hbm [shape: f32[1,1024], index: 8, kind: output, shape index: {}]  }
   0x1   :  { %13 = sst [smem:[#allocation2]] %s4931_s7 }
   0x2   :  { %14 = vsyncpa [#allocation4], 0 }
   0x3   :  { %16 = vsyncpa [#allocation4 + $0x1], 0  ;;  %s4095_s29 = smov 0   ;;  %s4097_s30 = smov 0  }
   0x4   :  { %s4099_s9 = smov 0   ;;  %s4101_s10 = smov 0  }
   0x5 LB: > { %s4116_s7 = sadd.s32 4294967295, %s4040_s10   ;;  %s3534_s11 = sadd.s32 4294967294, %s4040_s10   ;;  %s4040_s10 = sphi %s4101_s10, %s4985_s10   ;;  %s4036_s9 = sphi %s4099_s9, %s4984_s9   ;;  %s4032_s30 = sphi %s4097_s30, %s4983_s30   ;;  %s4028_s29 = sphi %s4095_s29, %s4982_s29  }
   0x6   : > { %s4120_s12 = sadd.s32 1, %s4040_s10   ;;  %s207_s13 = sadd.s32 1, %s4036_s9 }
   0x7   : > { %s204_s14 = ssub.s32 %s4040_s10, %s4120_s12  ;;  %p217_p0 = scmp.ne.s32.totalorder %s4036_s9, %s4032_s30 }
   0x8   : > { %p205_p1 = scmp.eq.s32.totalorder %s204_s14, 0  ;;  %p218_p2 = scmp.eq.s32.totalorder %s4116_s7, 1 }
   0x9   : > { %p223_p3 = scmp.ne.s32.totalorder %s4032_s30, %s4028_s29  ;;  %p224_p4 = scmp.eq.s32.totalorder %s3534_s11, 1 }
   0xa   : > { %s4131_s15 = scalar_select %p205_p1, %s4036_s9, %s207_s13  }
   0xb   : > { %p4133_p5 = por %p218_p2, %p217_p0  ;;  %p4137_p6 = por %p224_p4, %p223_p3 }
   0xc   : > { %p3537_p7 = scmp.ge.s32.totalorder %s4040_s10, 1  ;;  %p276_p8 = scmp.lt.s32.totalorder %s4040_s10, 3 }
   0xe   : > { %p277_p9 = pnand %p3537_p7, %p276_p8 }
  0x10   : > { %280 = sbr.rel (%p277_p9) target bundleno = 926 (0x39e), region = 52 }
  0x17   : > { %s3539_s18 = sshll.u32 %s4116_s7, 2  ;;  %v4933_v0 = vlaneseq  ;;  %v409_v1 = vld [vmem:[%s4926_s2] sm:$0xff]  ;;  %v410_v2 = vld [vmem:[%s4926_s2 + $0x8] sm:$0xff]  ;;  %v4042_v3 = vmov 0.0   ;;  %vm413_vm0 = vcmask 80896   ;;  %v411_v4 = vld [vmem:[%s4926_s2 + $0x10] sm:$0xff] }
  0x18   : > { %p314_p10 = scmp.lt.s32.totalorder %s3539_s18, 7  ;;  %507 = vmatprep.mubr.f32.mxu0 %v4042_v3  ;;  %1145 = vmatprep.mubr.f32.mxu1 %v4042_v3  ;;  %v412_v5 = vld [vmem:[%s4926_s2 + $0x18] sm:$0xff]  ;;  %v415_v7 = vsel %vm413_vm0, %v409_v1, 0  ;;  %v418_v8 = vsel %vm413_vm0, %v410_v2, 0  ;;  %v421_v9 = vsel %vm413_vm0, %v411_v4, 0  ;;  %vm426_vm1 = vcmask 1041408  }
  0x19   : > { %v4159_v6 = vshrl.u32 %v4933_v0, 7  ;;  %v4163_v10 = vand.u32 4294901760, %v415_v7  ;;  %v4165_v11 = vand.u32 4294901760, %v418_v8  ;;  %v4167_v12 = vand.u32 4294901760, %v421_v9  ;;  %v1716_v34 = vld [vmem:[%s4927_s3 + $0x8] sm:$0xff]  ;;  %s3273_s14 = sld [smem:[#allocation2]] }
  0x1a   : > { %s4987_s18 = smov (!%p314_p10, %s3539_s18), 7  ;;  %v424_v13 = vsel %vm413_vm0, %v412_v5, 0  ;;  %v4043_v38 = vmov 1.0   ;;  %vm1732_vm0 = vcmask 1043456   ;;  %s3620_s20 = sshll.u32 %s4116_s7, 6 }
  0x1b   : > { %v4170_v14 = vadd.s32 8, %v4159_v6  ;;  %v335_v15 = vsub.s32 1, %v4159_v6  ;;  %v343_v16 = vsub.s32 3, %v4159_v6  ;;  %v331_v17 = vsub.s32 0, %v4159_v6  ;;  %s316_s11 = scalar_lea.vmem %s4924_s0, %s4987_s18  ;;  %s321_s19 = scalar_lea.vmem %s4925_s1, %s4987_s18 }
  0x1c   : > { %v339_v18 = vsub.s32 2, %v4159_v6  ;;  %v4181_v19 = vsub.f32 %v415_v7, %v4163_v10  ;;  %v4184_v20 = vsub.f32 %v418_v8, %v4165_v11  ;;  %v4187_v21 = vsub.f32 %v421_v9, %v4167_v12  ;;  %v324_v22 = vld [vmem:[%s316_s11] sm:$0xf]  ;;  %s4882_s25 = scalar_lea.hbm %s4932_s8, %s3620_s20  ;;  %s4046_s7 = smov [#allocation3]  }
  0x1d   : > { %v4189_v23 = vand.u32 4294901760, %v424_v13  ;;  %v336_v24 = vrot.slane %v324_v22, %v335_v15  ;;  %v344_v25 = vrot.slane %v324_v22, %v343_v16  ;;  %v332_v26 = vrot.slane %v324_v22, %v331_v17  ;;  %s3982_s28 = sshll.u32 %s4046_s7, 4  ;;  %s3983_s28 = int_to_ptr.vmem [resolvable:$false] %s3982_s28 }
  0x1e   : > { %v340_v27 = vrot.slane %v324_v22, %v339_v18  ;;  %v4200_v28 = vand.u32 4294901760, %v4181_v19  ;;  %v4203_v29 = vand.u32 4294901760, %v4184_v20  ;;  %v4206_v30 = vand.u32 4294901760, %v4187_v21  ;;  %s3984_s11 = scalar_lea.vmem %s3983_s28, 128 }
  0x1f   : > { %v4209_v31 = vsub.f32 %v424_v13, %v4189_v23  ;;  %vm346_vm2 = vcmp.eq.s32.totalorder %v4159_v6, %v336_v24  ;;  %vm350_vm3 = vcmp.eq.s32.totalorder %v4170_v14, %v336_v24  ;;  %vm348_vm4 = vcmp.eq.s32.totalorder %v4159_v6, %v344_v25 }
  0x20   : > { %vm352_vm5 = vcmp.eq.s32.totalorder %v4170_v14, %v344_v25  ;;  %v3542_v32 = vsel %vm346_vm2, 1.0, %v4042_v3  ;;  %v3546_v33 = vsel %vm350_vm3, 1.0, %v4042_v3  ;;  %vm4218_vm6 = vmpackc.low %vm426_vm1, %vm346_vm2  ;;  %v3544_v35 = vsel %vm348_vm4, 1.0, %v4042_v3 }
  0x21   : > { %v3548_v36 = vsel %vm352_vm5, 1.0, %v4042_v3  ;;  %v431_v37 = vsel %vm426_vm1, %v3546_v33, 0  ;;  %v4226_v39 = vpack.c.bf16 %v3546_v33, %v4043_v38  ;;  %v4228_v40 = vsub.f32 %v3542_v32, %v3542_v32  ;;  %vm4232_vm7 = vmpackc.low %vm426_vm1, %vm348_vm4 }
  0x22   : > { %v437_v41 = vsel %vm426_vm1, %v3548_v36, 0  ;;  %v4236_v43 = vsub.f32 %v431_v37, %v431_v37  ;;  %v4239_v44 = vpack.c.bf16 %v3548_v36, %v4043_v38  ;;  %v4241_v45 = vsub.f32 %v3544_v35, %v3544_v35 }
  0x23   : > { %v4243_v46 = vsub.f32 %v437_v41, %v437_v41  ;;  %3623 = vmatprep.subr.msk.bf16.mxu0 %vm4218_vm6, %v4226_v39  ;;  %vm345_vm8 = vcmp.eq.s32.totalorder %v4159_v6, %v332_v26  ;;  %vm349_vm9 = vcmp.eq.s32.totalorder %v4170_v14, %v332_v26  ;;  %vm347_vm10 = vcmp.eq.s32.totalorder %v4159_v6, %v340_v27 }
  0x24   : > { %vm351_vm11 = vcmp.eq.s32.totalorder %v4170_v14, %v340_v27  ;;  %3653 = vmatprep.subr.msk.bf16.mxu1 %vm4232_vm7, %v4239_v44  ;;  %v3541_v47 = vsel %vm345_vm8, 1.0, %v4042_v3  ;;  %v3545_v48 = vsel %vm349_vm9, 1.0, %v4042_v3  ;;  %vm4258_vm12 = vmpackc.low %vm426_vm1, %vm345_vm8  ;;  %v3543_v50 = vsel %vm347_vm10, 1.0, %v4042_v3 }
  0x25   : > { %v3547_v51 = vsel %vm351_vm11, 1.0, %v4042_v3  ;;  %v428_v52 = vsel %vm426_vm1, %v3545_v48, 0  ;;  %v4266_v53 = vpack.c.bf16 %v3545_v48, %v4043_v38  ;;  %v4268_v54 = vsub.f32 %v3541_v47, %v3541_v47  ;;  %vm4272_vm13 = vmpackc.low %vm426_vm1, %vm347_vm10 }
  0x26   : > { %v434_v55 = vsel %vm426_vm1, %v3547_v51, 0  ;;  %v4276_v57 = vsub.f32 %v428_v52, %v428_v52  ;;  %v4279_v58 = vpack.c.bf16 %v3547_v51, %v4043_v38  ;;  %v4281_v59 = vsub.f32 %v3543_v50, %v3543_v50 }
  0x27   : > { %v4283_v60 = vsub.f32 %v434_v55, %v434_v55  ;;  %3626 = vmatpush1.bf16.msk.msra.mxu0 %vm4258_vm12, %v4266_v53  ;;  %v4937_v61 = vand.u32 4294901760, %v4268_v54  ;;  %v511_v62 = vsub.f32 %v4181_v19, %v4200_v28  ;;  %v522_v63 = vsub.f32 %v4184_v20, %v4203_v29 }
  0x28   : > { %v4941_v1 = vand.u32 4294901760, %v4228_v40  ;;  %v4936_v2 = vand.u32 4294901760, %v4276_v57  ;;  %3656 = vmatpush1.bf16.msk.msra.mxu1 %vm4272_vm13, %v4279_v58  ;;  %v4935_v4 = vand.u32 4294901760, %v4281_v59  ;;  %v4940_v7 = vand.u32 4294901760, %v4236_v43 }
  0x29   : > { %v4934_v5 = vand.u32 4294901760, %v4283_v60  ;;  %v561_v8 = vsub.f32 %v4268_v54, %v4937_v61  ;;  %v512_v9 = vand.u32 4294901760, %v511_v62  ;;  %v523_v13 = vand.u32 4294901760, %v522_v63 }
  0x2a   : > { %v555_v22 = vsub.f32 %v4228_v40, %v4941_v1  ;;  %v1199_v24 = vsub.f32 %v4281_v59, %v4935_v4  ;;  %v567_v25 = vsub.f32 %v4236_v43, %v4940_v7  ;;  %v4939_v26 = vand.u32 4294901760, %v4241_v45 }
  0x2b   : > { %v4938_v27 = vand.u32 4294901760, %v4243_v46  ;;  %v562_v32 = vand.u32 4294901760, %v561_v8  ;;  %513 = vmatmul.mubr.f32.vlgmr.msra.gmra.mrb[0].mxu0 %v512_v9  ;;  %1151 = vmatmul.mubr.f32.vlgmr.msra.gmra.mrb[0].mxu1 %v512_v9  ;;  %v573_v35 = vsub.f32 %v4276_v57, %v4936_v2  ;;  %v1211_v36 = vsub.f32 %v4283_v60, %v4934_v5 }
  0x2c   : > { %v556_v33 = vand.u32 4294901760, %v555_v22  ;;  %v1200_v37 = vand.u32 4294901760, %v1199_v24  ;;  %518 = vmatprep.mubr.f32.mxu0 %v4042_v3  ;;  %1156 = vmatprep.mubr.f32.mxu1 %v4042_v3  ;;  %v568_v41 = vand.u32 4294901760, %v567_v25  ;;  %v1193_v47 = vsub.f32 %v4241_v45, %v4939_v26 }
  0x2d   : > { %v1205_v48 = vsub.f32 %v4243_v46, %v4938_v27  ;;  %v574_v50 = vand.u32 4294901760, %v573_v35  ;;  %v1212_v51 = vand.u32 4294901760, %v1211_v36  ;;  %v533_v52 = vsub.f32 %v4187_v21, %v4206_v30  ;;  %v325_v36 = vld [vmem:[%s321_s19] sm:$0xf]  ;;  %s310_s19 = sand.u32 1, %s4032_s30  }
  0x2e   : > { %v4336_v55 = vand.u32 4294901760, %v4209_v31  ;;  %v3627_v62 = vpack.c.bf16 %v568_v41, %v556_v33  ;;  %v1194_v63 = vand.u32 4294901760, %v1193_v47  ;;  %v3631_v9 = vpack.c.bf16 %v4236_v43, %v4228_v40  ;;  %s3538_s18 = sshll.u32 %s310_s19, 2  ;;  %s3455_s26 = scalar_lea.sflag [#allocation4], %s310_s19 }
  0x2f   : > { %v1206_v8 = vand.u32 4294901760, %v1205_v48  ;;  %524 = vmatmul.mubr.f32.gmra.mrb[2].mxu0 %v523_v13  ;;  %1162 = vmatmul.mubr.f32.gmra.mrb[2].mxu1 %v523_v13  ;;  %v3629_v22 = vpack.c.bf16 %v574_v50, %v562_v32  ;;  %v3659_v24 = vpack.c.bf16 %v1212_v51, %v1200_v37  ;;  %v534_v25 = vand.u32 4294901760, %v533_v52  ;;  %s312_s21 = scalar_lea.vmem [#allocation3], %s3538_s18 }
  0x30   : > { %v544_v35 = vsub.f32 %v4209_v31, %v4336_v55  ;;  %3628 = vmatprep.subr.bf16.mxu0 %v3627_v62  ;;  %529 = vmatprep.mubr.f32.mxu0 %v4042_v3  ;;  %v3661_v33 = vpack.c.bf16 %v4243_v46, %v4241_v45  ;;  %v3633_v13 = vpack.c.bf16 %v4276_v57, %v4268_v54  ;;  %vm1719_vm9 = vcmask 97280   ;;  %s3469_s22 = sshll.u32 %s312_s21, 4  ;;  %s4884_s22 = int_to_ptr.vmem [resolvable:$true] %s3469_s22 }
  0x31   : > { %v3657_v0 = vpack.c.bf16 %v1206_v8, %v1194_v63  ;;  %3630 = vmatpush1.bf16.msra.mxu0 %v3629_v22  ;;  %1167 = vmatprep.mubr.f32.mxu1 %v4042_v3  ;;  %v4350_v32 = vrot.slane %v325_v36, %v335_v15  ;;  %v4354_v41 = vrot.slane %v325_v36, %v343_v16  ;;  %v1724_v42 = vsel %vm1719_vm9, %v1716_v34, 0  ;;  %s3978_s27 = scalar_lea.vmem %s4884_s22, 64  ;;  %p3985_p0 = scmp.lt.s32.totalorder %s4884_s22, %s3983_s28 }
  0x32   : > { %3632 = vmatprep.subr.bf16.mxu0 %v3631_v9  ;;  %v545_v37 = vand.u32 4294901760, %v544_v35  ;;  %v4358_v47 = vrot.slane %v325_v36, %v331_v17  ;;  %v3663_v15 = vpack.c.bf16 %v4283_v60, %v4281_v59  ;;  %v4637_v56 = vand.u32 4294901760, %v1724_v42  ;;  %p3979_p11 = scmp.ne.s32.totalorder %s4884_s22, %s3978_s27  ;;  %p3986_p1 = scmp.lt.s32.totalorder %s3984_s11, %s3978_s27 }
  0x33   : > { %3658 = vmatprep.subr.bf16.mxu1 %v3657_v0  ;;  %535 = vmatmul.mubr.f32.gmra.mrb[4].mxu0 %v534_v25  ;;  %v4362_v0 = vrot.slane %v325_v36, %v339_v18  ;;  %vm386_vm14 = vcmp.eq.s32.totalorder %v4159_v6, %v4350_v32  ;;  %vm390_vm15 = vcmp.eq.s32.totalorder %v4170_v14, %v4350_v32 }
  0x34   : > { %3660 = vmatpush1.bf16.msra.mxu1 %v3659_v24  ;;  %540 = vmatprep.mubr.f32.mxu0 %v4042_v3  ;;  %v3550_v16 = vsel %vm386_vm14, 1.0, %v4042_v3  ;;  %v3554_v17 = vsel %vm390_vm15, 1.0, %v4042_v3  ;;  %vm388_vm1 = vcmp.eq.s32.totalorder %v4159_v6, %v4354_v41  ;;  %vm392_vm2 = vcmp.eq.s32.totalorder %v4170_v14, %v4354_v41  ;;  %p3980_p12 = pnand %p3979_p11, %p4133_p5  ;;  %p3987_p2 = por %p3986_p1, %p3985_p0 }
  0x35   : > { %4955 = vst [vmem:[#allocation6_spill] sm:$0xff] %v4362_v0  ;;  %1173 = vmatmul.mubr.f32.gmra.mrb[4].mxu1 %v534_v25  ;;  %3662 = vmatprep.subr.bf16.mxu1 %v3661_v33  ;;  %v1737_v18 = vsel %vm1732_vm0, %v3554_v17, 0  ;;  %v4383_v48 = vpack.c.bf16 %v3554_v17, %v4043_v38  ;;  %v4385_v50 = vsub.f32 %v3550_v16, %v3550_v16  ;;  %v3552_v51 = vsel %vm388_vm1, 1.0, %v4042_v3 }
  0x36   : > { %1178 = vmatprep.mubr.f32.mxu1 %v4042_v3  ;;  %v4391_v52 = vsub.f32 %v1737_v18, %v1737_v18  ;;  %v3556_v62 = vsel %vm392_vm2, 1.0, %v4042_v3  ;;  %v4394_v63 = vsub.f32 %v3552_v51, %v3552_v51  ;;  %vm385_vm3 = vcmp.eq.s32.totalorder %v4159_v6, %v4358_v47  ;;  %p3981_p13 = pneg %p3980_p12 }
  0x37   : > { %546 = vmatmul.mubr.f32.gmra.mrb[6].mxu0 %v545_v37  ;;  %v1743_v8 = vsel %vm1732_vm0, %v3556_v62, 0  ;;  %v4401_v9 = vpack.c.bf16 %v3556_v62, %v4043_v38  ;;  %vm389_vm4 = vcmp.eq.s32.totalorder %v4170_v14, %v4358_v47  ;;  %v3549_v22 = vsel %vm385_vm3, 1.0, %v4042_v3  ;;  %vm4621_vm10 = vmpackc.low %vm1732_vm0, %vm385_vm3 }
  0x38   : > { %636 = vmatprep.mubr.f32.mxu0 %v4042_v3  ;;  %v4410_v24 = vsub.f32 %v1743_v8, %v1743_v8  ;;  %v3553_v25 = vsel %vm389_vm4, 1.0, %v4042_v3  ;;  %v4413_v35 = vsub.f32 %v3549_v22, %v3549_v22  ;;  %vm387_vm5 = vcmp.eq.s32.totalorder %v4159_v6, %v4362_v0  ;;  %p3988_p3 = pnand %p3987_p2, %p3981_p13 }
  0x39   : > { %1184 = vmatmul.mubr.f32.gmra.mrb[6].mxu1 %v545_v37  ;;  %v1734_v36 = vsel %vm1732_vm0, %v3553_v25, 0  ;;  %v4419_v33 = vpack.c.bf16 %v3553_v25, %v4043_v38  ;;  %vm391_vm8 = vcmp.eq.s32.totalorder %v4170_v14, %v4362_v0  ;;  %v3551_v37 = vsel %vm387_vm5, 1.0, %v4042_v3  ;;  %vm4630_vm11 = vmpackc.low %vm1732_vm0, %vm387_vm5 }
  0x3a   : > { %1274 = vmatprep.mubr.f32.mxu1 %v4042_v3  ;;  %v4428_v16 = vsub.f32 %v1734_v36, %v1734_v36  ;;  %v3555_v17 = vsel %vm391_vm8, 1.0, %v4042_v3  ;;  %v1860_v14 = vand.u32 4294901760, %v4385_v50  ;;  %v4439_v62 = vsub.f32 %v3551_v37, %v3551_v37 }
  0x3b   : > { %4956 = vst [vmem:[#allocation7_spill] sm:$0xff] %v4419_v33  ;;  %638 = vmatmul.mubr.f32.vlgmr.msra.gmra.mrb[0].mxu0 %v4163_v10  ;;  %v1740_v18 = vsel %vm1732_vm0, %v3555_v17, 0  ;;  %v4435_v51 = vpack.c.bf16 %v3555_v17, %v4043_v38  ;;  %v1872_v8 = vand.u32 4294901760, %v4391_v52  ;;  %v2498_v22 = vand.u32 4294901760, %v4394_v63 }
  0x3c   : > { %643 = vmatprep.mubr.f32.mxu0 %v4042_v3  ;;  %3634 = vmatpush1.bf16.msra.mxu0 %v3633_v13  ;;  %v4446_v25 = vsub.f32 %v1740_v18, %v1740_v18  ;;  %v1861_v38 = vsub.f32 %v4385_v50, %v1860_v14  ;;  %v2510_v36 = vand.u32 4294901760, %v4410_v24  ;;  %v1866_v17 = vand.u32 4294901760, %v4413_v35 }
  0x3d   : > { %1276 = vmatmul.mubr.f32.vlgmr.msra.gmra.mrb[0].mxu1 %v4163_v10  ;;  %4957 = vst [vmem:[#allocation8_spill] sm:$0xff] %v4435_v51  ;;  %3637 = vmatprep.subr.msk.bf16.mxu0 %vm4218_vm6, %v4226_v39  ;;  %v1873_v13 = vsub.f32 %v4391_v52, %v1872_v8  ;;  %v1878_v37 = vand.u32 4294901760, %v4428_v16  ;;  %v2504_v26 = vand.u32 4294901760, %v4439_v62 }
  0x3e   : > { %1281 = vmatprep.mubr.f32.mxu1 %v4042_v3  ;;  %3664 = vmatpush1.bf16.msra.mxu1 %v3663_v15  ;;  %v2499_v15 = vsub.f32 %v4394_v63, %v2498_v22  ;;  %v1862_v18 = vand.u32 4294901760, %v1861_v38  ;;  %v2511_v5 = vsub.f32 %v4410_v24, %v2510_v36  ;;  %v1867_v4 = vsub.f32 %v4413_v35, %v1866_v17 }
  0x3f   : > { %645 = vmatmul.mubr.f32.gmra.mrb[2].mxu0 %v4165_v11  ;;  %3667 = vmatprep.subr.msk.bf16.mxu1 %vm4232_vm7, %v4239_v44  ;;  %v1874_v2 = vand.u32 4294901760, %v1873_v13  ;;  %v1879_v27 = vsub.f32 %v4428_v16, %v1878_v37  ;;  %v2516_v51 = vand.u32 4294901760, %v4446_v25  ;;  %v2505_v0 = vsub.f32 %v4439_v62, %v2504_v26 }
  0x40   : > { %650 = vmatprep.mubr.f32.mxu0 %v4042_v3  ;;  %v2500_v61 = vand.u32 4294901760, %v2499_v15  ;;  %v2512_v7 = vand.u32 4294901760, %v2511_v5  ;;  %v1868_v1 = vand.u32 4294901760, %v1867_v4 }
  0x41   : > { %1283 = vmatmul.mubr.f32.gmra.mrb[2].mxu1 %v4165_v11  ;;  %v4467_v33 = vpack.c.bf16 %v1874_v2, %v1862_v18  ;;  %v1880_v38 = vand.u32 4294901760, %v1879_v27  ;;  %v2517_v15 = vsub.f32 %v4446_v25, %v2516_v51  ;;  %v2506_v5 = vand.u32 4294901760, %v2505_v0 }
  0x42   : > { %1288 = vmatprep.mubr.f32.mxu1 %v4042_v3  ;;  %v4472_v13 = vpack.c.bf16 %v2512_v7, %v2500_v61  ;;  %v3691_v2 = vpack.c.bf16 %v4391_v52, %v4385_v50  ;;  %v3721_v27 = vpack.c.bf16 %v4410_v24, %v4394_v63  ;;  %v4487_v7 = vpack.c.bf16 %v1872_v8, %v1860_v14 }
  0x43   : > { %652 = vmatmul.mubr.f32.gmra.mrb[4].mxu0 %v4167_v12  ;;  %4958 = vst [vmem:[#allocation9_spill] sm:$0xff] %v4467_v33  ;;  %v4476_v4 = vpack.c.bf16 %v1880_v38, %v1868_v1  ;;  %v2518_v18 = vand.u32 4294901760, %v2517_v15  ;;  %v4489_v1 = vpack.c.bf16 %v2510_v36, %v2498_v22  ;;  %v4495_v38 = vpack.c.bf16 %v1878_v37, %v1866_v17 }
  0x44   : > { %657 = vmatprep.mubr.f32.mxu0 %v4042_v3  ;;  %v4497_v15 = vpack.c.bf16 %v2516_v51, %v2504_v26  ;;  %v4959_v33 = vand.u32 4294901760, %v4228_v40  ;;  %v4960_v61 = vand.u32 4294901760, %v4236_v43  ;;  %v4961_v8 = vand.u32 4294901760, %v4241_v45 }
  0x45   : > { %1290 = vmatmul.mubr.f32.gmra.mrb[4].mxu1 %v4167_v12  ;;  %v4493_v0 = vpack.c.bf16 %v2518_v18, %v2506_v5  ;;  %v4962_v22 = vand.u32 4294901760, %v4243_v46  ;;  %v4965_v43 = vand.u32 4294901760, %v4281_v59  ;;  %v1718_v59 = vld [vmem:[%s4927_s3 + $0x18] sm:$0xff]  ;;  %v4979_v50 = vpack.c.bf16 %v4428_v16, %v4413_v35  ;;  %v3041_v35 = vld [vmem:[%s4929_s5] sm:$0xff]  ;;  %v3043_v16 = vld [vmem:[%s4929_s5 + $0x10] sm:$0xff] }
  0x46   : > { %1295 = vmatprep.mubr.f32.mxu1 %v4042_v3  ;;  %v3641_v14 = vpack.c.bf16 %v4960_v61, %v4959_v33  ;;  %v1730_v41 = vsel %vm1719_vm9, %v1718_v59, 0  ;;  %v4980_v52 = vpack.c.bf16 %v4446_v25, %v4439_v62  ;;  %v4044_v25 = vmov 0  }
  0x47   : > { %659 = vmatmul.mubr.f32.gmra.mrb[6].mxu0 %v4189_v23  ;;  %v3671_v36 = vpack.c.bf16 %v4962_v22, %v4961_v8  ;;  %v4676_v17 = vand.u32 4294901760, %v1730_v41  ;;  %3976 = vset.pattern.permute.xlu0 %v4044_v25 }
  0x48   : > { %737 = vmatprep.mubr.f32.mxu0 %v4042_v3  ;;  %3977 = vset.pattern.permute.xlu1 %v4044_v25 }
  0x49   : > { %1297 = vmatmul.mubr.f32.gmra.mrb[6].mxu1 %v4189_v23  ;;  %v4688_v5 = vsub.f32 %v1730_v41, %v4676_v17  ;;  %3047 = vperm.xlu0 %3976, %v3041_v35  }
  0x4a   : > { %1375 = vmatprep.mubr.f32.mxu1 %v4042_v3  ;;  %v4978_v26 = vld [vmem:[#allocation9_spill] sm:$0xff]  ;;  %3057 = vperm.xlu1 %3977, %v3043_v16  }
  0x4b   : > { %740 = vmatmul.mubr.f32.vlgmr.msra.gmra.mrb[0].mxu0 %v4181_v19  ;;  %v4696_v61 = vand.u32 4294901760, %v4688_v5 }
  0x4c   : > { %745 = vmatprep.mubr.f32.mxu0 %v4042_v3  ;;  %3640 = vmatpush1.bf16.msk.msra.mxu0 %vm4258_vm12, %v4266_v53 }
  0x4d   : > { %1378 = vmatmul.mubr.f32.vlgmr.msra.gmra.mrb[0].mxu1 %v4181_v19  ;;  %3642 = vmatprep.subr.bf16.mxu0 %v3641_v14  ;;  %v4963_v19 = vand.u32 4294901760, %v4268_v54  ;;  %v1850_v14 = vsub.f32 %v4688_v5, %v4696_v61 }
  0x4e   : > { %1383 = vmatprep.mubr.f32.mxu1 %v4042_v3  ;;  %3670 = vmatpush1.bf16.msk.msra.mxu1 %vm4272_vm13, %v4279_v58 }
  0x4f   : > { %748 = vmatmul.mubr.f32.gmra.mrb[2].mxu0 %v4184_v20  ;;  %3672 = vmatprep.subr.bf16.mxu1 %v3671_v36 }
  0x50   : > { %753 = vmatprep.mubr.f32.mxu0 %v4042_v3 }
  0x51   : > { %1386 = vmatmul.mubr.f32.gmra.mrb[2].mxu1 %v4184_v20  ;;  %v4964_v20 = vand.u32 4294901760, %v4276_v57 }
  0x52   : > { %1391 = vmatprep.mubr.f32.mxu1 %v4042_v3 }
  0x53   : > { %756 = vmatmul.mubr.f32.gmra.mrb[4].mxu0 %v4187_v21  ;;  %v3643_v40 = vpack.c.bf16 %v4964_v20, %v4963_v19 }
  0x54   : > { %761 = vmatprep.mubr.f32.mxu0 %v4042_v3 }
  0x55   : > { %1394 = vmatmul.mubr.f32.gmra.mrb[4].mxu1 %v4187_v21  ;;  %v4966_v21 = vand.u32 4294901760, %v4283_v60  ;;  %v4977_v60 = vld [vmem:[#allocation8_spill] sm:$0xff] }
  0x56   : > { %1399 = vmatprep.mubr.f32.mxu1 %v4042_v3 }
  0x57   : > { %764 = vmatmul.mubr.f32.gmra.mrb[6].mxu0 %v4209_v31  ;;  %v3673_v45 = vpack.c.bf16 %v4966_v21, %v4965_v43 }
  0x58   : > { %838 = vmatprep.mubr.f32.mxu0 %v4042_v3 }
  0x59   : > { %1402 = vmatmul.mubr.f32.gmra.mrb[6].mxu1 %v4209_v31 }
  0x5a   : > { %1476 = vmatprep.mubr.f32.mxu1 %v4042_v3 }
  0x5b   : > { %842 = vmatmul.mubr.f32.vlgmr.msra.gmra.mrb[0].mxu0 %v4200_v28 }
  0x5c   : > { %847 = vmatprep.mubr.f32.mxu0 %v4042_v3  ;;  %3644 = vmatpush1.bf16.msra.mxu0 %v3643_v40 }
  0x5d   : > { %1480 = vmatmul.mubr.f32.vlgmr.msra.gmra.mrb[0].mxu1 %v4200_v28  ;;  %3647 = vmatprep.subr.msk.bf16.mxu0 %vm4218_vm6, %v4226_v39  ;;  %vm4565_vm6 = vmpackc.low %vm1732_vm0, %vm386_vm14 }
  0x5e   : > { %1485 = vmatprep.mubr.f32.mxu1 %v4042_v3  ;;  %3674 = vmatpush1.bf16.msra.mxu1 %v3673_v45 }
  0x5f   : > { %851 = vmatmul.mubr.f32.gmra.mrb[2].mxu0 %v4203_v29  ;;  %3677 = vmatprep.subr.msk.bf16.mxu1 %vm4232_vm7, %v4239_v44  ;;  %vm4575_vm7 = vmpackc.low %vm1732_vm0, %vm388_vm1  ;;  %v1717_v44 = vld [vmem:[%s4927_s3 + $0x10] sm:$0xff] }
  0x60   : > { %856 = vmatprep.mubr.f32.mxu0 %v4042_v3  ;;  %v1727_v57 = vsel %vm1719_vm9, %v1717_v44, 0 }
  0x61   : > { %1489 = vmatmul.mubr.f32.gmra.mrb[2].mxu1 %v4203_v29  ;;  %v4661_v32 = vand.u32 4294901760, %v1727_v57 }
  0x62   : > { %1494 = vmatprep.mubr.f32.mxu1 %v4042_v3 }
  0x63   : > { %860 = vmatmul.mubr.f32.gmra.mrb[4].mxu0 %v4206_v30  ;;  %v4674_v51 = vsub.f32 %v1727_v57, %v4661_v32 }
  0x64   : > { %865 = vmatprep.mubr.f32.mxu0 %v4042_v3 }
  0x65   : > { %1498 = vmatmul.mubr.f32.gmra.mrb[4].mxu1 %v4206_v30  ;;  %v1715_v30 = vld [vmem:[%s4927_s3] sm:$0xff] }
  0x66   : > { %1503 = vmatprep.mubr.f32.mxu1 %v4042_v3  ;;  %v1721_v31 = vsel %vm1719_vm9, %v1715_v30, 0 }
  0x67   : > { %869 = vmatmul.mubr.f32.gmra.mrb[6].mxu0 %v4336_v55  ;;  %v4608_v39 = vand.u32 4294901760, %v1721_v31 }
  0x68   : > { %951 = vmatprep.mubr.f32.mxu0 %v4042_v3 }
  0x69   : > { %1507 = vmatmul.mubr.f32.gmra.mrb[6].mxu1 %v4336_v55  ;;  %v4635_v54 = vsub.f32 %v1721_v31, %v4608_v39  ;;  %v4658_v55 = vsub.f32 %v1724_v42, %v4637_v56 }
  0x6a   : > { %1589 = vmatprep.mubr.f32.mxu1 %v4042_v3 }
  0x6b   : > { %953 = vmatmul.mubr.f32.vlgmr.msra.gmra.mrb[0].mxu0 %v4163_v10  ;;  %v4671_v33 = vand.u32 4294901760, %v4658_v55 }
  0x6c   : > { %958 = vmatprep.mubr.f32.mxu0 %v4042_v3  ;;  %3650 = vmatpush1.bf16.msk.msra.mxu0 %vm4258_vm12, %v4266_v53  ;;  %vm3065_vm12 = vcmask 261120  }
  0x6d   : > { %1591 = vmatmul.mubr.f32.vlgmr.msra.gmra.mrb[0].mxu1 %v4163_v10  ;;  %3683 = vmatprep.subr.msk.bf16.mxu0 %vm4565_vm6, %v4383_v48  ;;  %v1828_v37 = vsub.f32 %v4658_v55, %v4671_v33 }
  0x6e   : > { %1596 = vmatprep.mubr.f32.mxu1 %v4042_v3  ;;  %3680 = vmatpush1.bf16.msk.msra.mxu1 %vm4272_vm13, %v4279_v58  ;;  %v4976_v58 = vld [vmem:[#allocation7_spill] sm:$0xff] }
  0x6f   : > { %960 = vmatmul.mubr.f32.gmra.mrb[2].mxu0 %v4165_v11  ;;  %3713 = vmatprep.subr.msk.bf16.mxu1 %vm4575_vm7, %v4401_v9 }
  0x70   : > { %965 = vmatprep.mubr.f32.mxu0 %v4042_v3 }
  0x71   : > { %1598 = vmatmul.mubr.f32.gmra.mrb[2].mxu1 %v4165_v11 }
  0x72   : > { %1603 = vmatprep.mubr.f32.mxu1 %v4042_v3 }
  0x73   : > { %967 = vmatmul.mubr.f32.gmra.mrb[4].mxu0 %v4167_v12 }
  0x74   : > { %972 = vmatprep.mubr.f32.mxu0 %v4042_v3 }
  0x75   : > { %1605 = vmatmul.mubr.f32.gmra.mrb[4].mxu1 %v4167_v12 }
  0x76   : > { %1610 = vmatprep.mubr.f32.mxu1 %v4042_v3 }
  0x77   : > { %974 = vmatmul.mubr.f32.gmra.mrb[6].mxu0 %v4189_v23 }
  0x78   : > { %1048 = vmatprep.mubr.f32.mxu0 %v4042_v3 }
  0x79   : > { %1612 = vmatmul.mubr.f32.gmra.mrb[6].mxu1 %v4189_v23 }
  0x7a   : > { %1686 = vmatprep.mubr.f32.mxu1 %v4042_v3 }
  0x7b   : > { %1050 = vmatmul.mubr.f32.vlgmr.msra.gmra.mrb[0].mxu0 %v4163_v10 }
  0x7c   : > { %1055 = vmatprep.mubr.f32.mxu0 %v4042_v3  ;;  %3686 = vmatpush1.bf16.msk.msra.mxu0 %vm4621_vm10, %v4976_v58 }
  0x7d   : > { %1688 = vmatmul.mubr.f32.vlgmr.msra.gmra.mrb[0].mxu1 %v4163_v10  ;;  %3688 = vmatprep.subr.bf16.mxu0 %v4978_v26  ;;  %v4655_v10 = vand.u32 4294901760, %v4635_v54 }
  0x7e   : > { %1693 = vmatprep.mubr.f32.mxu1 %v4042_v3  ;;  %3716 = vmatpush1.bf16.msk.msra.mxu1 %vm4630_vm11, %v4977_v60 }
  0x7f   : > { %1057 = vmatmul.mubr.f32.gmra.mrb[2].mxu0 %v4165_v11  ;;  %3718 = vmatprep.subr.bf16.mxu1 %v4472_v13  ;;  %v1817_v47 = vsub.f32 %v4635_v54, %v4655_v10  ;;  %v4685_v13 = vand.u32 4294901760, %v4674_v51 }
  0x80   : > { %1062 = vmatprep.mubr.f32.mxu0 %v4042_v3 }
  0x81   : > { %1695 = vmatmul.mubr.f32.gmra.mrb[2].mxu1 %v4165_v11  ;;  %v1818_v11 = vand.u32 4294901760, %v1817_v47  ;;  %v1839_v18 = vsub.f32 %v4674_v51, %v4685_v13 }
  0x82   : > { %1700 = vmatprep.mubr.f32.mxu1 %v4042_v3 }
  0x83   : > { %1064 = vmatmul.mubr.f32.gmra.mrb[4].mxu0 %v4167_v12 }
  0x84   : > { %1069 = vmatprep.mubr.f32.mxu0 %v4042_v3 }
  0x85   : > { %1702 = vmatmul.mubr.f32.gmra.mrb[4].mxu1 %v4167_v12  ;;  %v1829_v12 = vand.u32 4294901760, %v1828_v37 }
  0x86   : > { %1707 = vmatprep.mubr.f32.mxu1 %v4042_v3 }
  0x87   : > { %1071 = vmatmul.mubr.f32.gmra.mrb[6].mxu0 %v4189_v23 }
  0x88   : > { %1813 = vmatprep.mubr.f32.mxu0 %v4042_v3 }
  0x89   : > { %1709 = vmatmul.mubr.f32.gmra.mrb[6].mxu1 %v4189_v23  ;;  %v1840_v23 = vand.u32 4294901760, %v1839_v18 }
  0x8a   : > { %2451 = vmatprep.mubr.f32.mxu1 %v4042_v3 }
  0x8b   : > { %1819 = vmatmul.mubr.f32.vlgmr.msra.gmra.mrb[8].mxu0 %v1818_v11 }
  0x8c   : > { %1824 = vmatprep.mubr.f32.mxu0 %v4042_v3  ;;  %3690 = vmatpush1.bf16.msra.mxu0 %v4476_v4  ;;  %v1851_v4 = vand.u32 4294901760, %v1850_v14 }
  0x8d   : > { %2457 = vmatmul.mubr.f32.vlgmr.msra.gmra.mrb[8].mxu1 %v1818_v11  ;;  %3692 = vmatprep.subr.bf16.mxu0 %v3691_v2 }
  0x8e   : > { %2462 = vmatprep.mubr.f32.mxu1 %v4042_v3  ;;  %3720 = vmatpush1.bf16.msra.mxu1 %v4493_v0  ;;  %v3044_v0 = vld [vmem:[%s4929_s5 + $0x18] sm:$0xff] }
  0x8f   : > { %1830 = vmatmul.mubr.f32.gmra.mrb[10].mxu0 %v1829_v12  ;;  %3722 = vmatprep.subr.bf16.mxu1 %v3721_v27 }
  0x90   : > { %1835 = vmatprep.mubr.f32.mxu0 %v4042_v3  ;;  %3062 = vperm.xlu1 %3977, %v3044_v0  }
  0x91   : > { %2468 = vmatmul.mubr.f32.gmra.mrb[10].mxu1 %v1829_v12 }
  0x92   : > { %2473 = vmatprep.mubr.f32.mxu1 %v4042_v3 }
  0x93   : > { %1841 = vmatmul.mubr.f32.gmra.mrb[12].mxu0 %v1840_v23 }
  0x94   : > { %1846 = vmatprep.mubr.f32.mxu0 %v4042_v3 }
  0x95   : > { %2479 = vmatmul.mubr.f32.gmra.mrb[12].mxu1 %v1840_v23 }
  0x96   : > { %2484 = vmatprep.mubr.f32.mxu1 %v4042_v3 }
  0x97   : > { %1852 = vmatmul.mubr.f32.gmra.mrb[14].mxu0 %v1851_v4 }
  0x98   : > { %1942 = vmatprep.mubr.f32.mxu0 %v4042_v3 }
  0x99   : > { %2490 = vmatmul.mubr.f32.gmra.mrb[14].mxu1 %v1851_v4 }
  0x9a   : > { %2580 = vmatprep.mubr.f32.mxu1 %v4042_v3 }
  0x9b   : > { %1944 = vmatmul.mubr.f32.vlgmr.msra.gmra.mrb[8].mxu0 %v4608_v39 }
  0x9c   : > { %1949 = vmatprep.mubr.f32.mxu0 %v4042_v3  ;;  %3694 = vmatpush1.bf16.msra.mxu0 %v4979_v50 }
  0x9d   : > { %2582 = vmatmul.mubr.f32.vlgmr.msra.gmra.mrb[8].mxu1 %v4608_v39  ;;  %3697 = vmatprep.subr.msk.bf16.mxu0 %vm4565_vm6, %v4383_v48 }
  0x9e   : > { %2587 = vmatprep.mubr.f32.mxu1 %v4042_v3  ;;  %3724 = vmatpush1.bf16.msra.mxu1 %v4980_v52  ;;  %v3037_v52 = vld [vmem:[%s4928_s4] sm:$0xff] }
  0x9f   : > { %1951 = vmatmul.mubr.f32.gmra.mrb[10].mxu0 %v4637_v56  ;;  %3727 = vmatprep.subr.msk.bf16.mxu1 %vm4575_vm7, %v4401_v9 }
  0xa0   : > { %1956 = vmatprep.mubr.f32.mxu0 %v4042_v3 }
  0xa1   : > { %2589 = vmatmul.mubr.f32.gmra.mrb[10].mxu1 %v4637_v56 }
  0xa2   : > { %2594 = vmatprep.mubr.f32.mxu1 %v4042_v3 }
  0xa3   : > { %1958 = vmatmul.mubr.f32.gmra.mrb[12].mxu0 %v4661_v32 }
  0xa4   : > { %1963 = vmatprep.mubr.f32.mxu0 %v4042_v3 }
  0xa5   : > { %2596 = vmatmul.mubr.f32.gmra.mrb[12].mxu1 %v4661_v32 }
  0xa6   : > { %2601 = vmatprep.mubr.f32.mxu1 %v4042_v3 }
  0xa7   : > { %1965 = vmatmul.mubr.f32.gmra.mrb[14].mxu0 %v4676_v17 }
  0xa8   : > { %2043 = vmatprep.mubr.f32.mxu0 %v4042_v3 }
  0xa9   : > { %2603 = vmatmul.mubr.f32.gmra.mrb[14].mxu1 %v4676_v17 }
  0xaa   : > { %2681 = vmatprep.mubr.f32.mxu1 %v4042_v3 }
  0xab   : > { %2046 = vmatmul.mubr.f32.vlgmr.msra.gmra.mrb[8].mxu0 %v4635_v54 }
  0xac   : > { %2051 = vmatprep.mubr.f32.mxu0 %v4042_v3  ;;  %3700 = vmatpush1.bf16.msk.msra.mxu0 %vm4621_vm10, %v4976_v58 }
  0xad   : > { %2684 = vmatmul.mubr.f32.vlgmr.msra.gmra.mrb[8].mxu1 %v4635_v54  ;;  %3702 = vmatprep.subr.bf16.mxu0 %v4487_v7 }
  0xae   : > { %2689 = vmatprep.mubr.f32.mxu1 %v4042_v3  ;;  %3730 = vmatpush1.bf16.msk.msra.mxu1 %vm4630_vm11, %v4977_v60 }
  0xaf   : > { %2054 = vmatmul.mubr.f32.gmra.mrb[10].mxu0 %v4658_v55  ;;  %3732 = vmatprep.subr.bf16.mxu1 %v4489_v1  ;;  %v3042_v1 = vld [vmem:[%s4929_s5 + $0x8] sm:$0xff] }
  0xb0   : > { %2059 = vmatprep.mubr.f32.mxu0 %v4042_v3  ;;  %3052 = vperm.xlu0 %3976, %v3042_v1  }
  0xb1   : > { %2692 = vmatmul.mubr.f32.gmra.mrb[10].mxu1 %v4658_v55 }
  0xb2   : > { %2697 = vmatprep.mubr.f32.mxu1 %v4042_v3 }
  0xb3   : > { %2062 = vmatmul.mubr.f32.gmra.mrb[12].mxu0 %v4674_v51 }
  0xb4   : > { %2067 = vmatprep.mubr.f32.mxu0 %v4042_v3 }
  0xb5   : > { %2700 = vmatmul.mubr.f32.gmra.mrb[12].mxu1 %v4674_v51 }
  0xb6   : > { %2705 = vmatprep.mubr.f32.mxu1 %v4042_v3 }
  0xb7   : > { %2070 = vmatmul.mubr.f32.gmra.mrb[14].mxu0 %v4688_v5 }
  0xb8   : > { %2144 = vmatprep.mubr.f32.mxu0 %v4042_v3 }
  0xb9   : > { %2708 = vmatmul.mubr.f32.gmra.mrb[14].mxu1 %v4688_v5 }
  0xba   : > { %2782 = vmatprep.mubr.f32.mxu1 %v4042_v3 }
  0xbb   : > { %2148 = vmatmul.mubr.f32.vlgmr.msra.gmra.mrb[8].mxu0 %v4655_v10 }
  0xbc   : > { %2153 = vmatprep.mubr.f32.mxu0 %v4042_v3  ;;  %3704 = vmatpush1.bf16.msra.mxu0 %v4495_v38 }
  0xbd   : > { %2786 = vmatmul.mubr.f32.vlgmr.msra.gmra.mrb[8].mxu1 %v4655_v10  ;;  %3707 = vmatprep.subr.msk.bf16.mxu0 %vm4565_vm6, %v4383_v48 }
  0xbe   : > { %2791 = vmatprep.mubr.f32.mxu1 %v4042_v3  ;;  %3734 = vmatpush1.bf16.msra.mxu1 %v4497_v15 }
  0xbf   : > { %2157 = vmatmul.mubr.f32.gmra.mrb[10].mxu0 %v4671_v33  ;;  %3737 = vmatprep.subr.msk.bf16.mxu1 %vm4575_vm7, %v4401_v9 }
  0xc0   : > { %2162 = vmatprep.mubr.f32.mxu0 %v4042_v3 }
  0xc1   : > { %2795 = vmatmul.mubr.f32.gmra.mrb[10].mxu1 %v4671_v33 }
  0xc2   : > { %2800 = vmatprep.mubr.f32.mxu1 %v4042_v3 }
  0xc3   : > { %2166 = vmatmul.mubr.f32.gmra.mrb[12].mxu0 %v4685_v13 }
  0xc4   : > { %2171 = vmatprep.mubr.f32.mxu0 %v4042_v3 }
  0xc5   : > { %2804 = vmatmul.mubr.f32.gmra.mrb[12].mxu1 %v4685_v13 }
  0xc6   : > { %2809 = vmatprep.mubr.f32.mxu1 %v4042_v3 }
  0xc7   : > { %2175 = vmatmul.mubr.f32.gmra.mrb[14].mxu0 %v4696_v61 }
  0xc8   : > { %2257 = vmatprep.mubr.f32.mxu0 %v4042_v3 }
  0xc9   : > { %2813 = vmatmul.mubr.f32.gmra.mrb[14].mxu1 %v4696_v61 }
  0xca   : > { %2895 = vmatprep.mubr.f32.mxu1 %v4042_v3 }
  0xcb   : > { %2259 = vmatmul.mubr.f32.vlgmr.msra.gmra.mrb[8].mxu0 %v4608_v39 }
  0xcc   : > { %2264 = vmatprep.mubr.f32.mxu0 %v4042_v3  ;;  %3710 = vmatpush1.bf16.msk.msra.mxu0 %vm4621_vm10, %v4976_v58 }
  0xcd   : > { %2897 = vmatmul.mubr.f32.vlgmr.msra.gmra.mrb[8].mxu1 %v4608_v39 }
  0xce   : > { %2902 = vmatprep.mubr.f32.mxu1 %v4042_v3  ;;  %3740 = vmatpush1.bf16.msk.msra.mxu1 %vm4630_vm11, %v4977_v60 }
  0xcf   : > { %2266 = vmatmul.mubr.f32.gmra.mrb[10].mxu0 %v4637_v56 }
  0xd0   : > { %2271 = vmatprep.mubr.f32.mxu0 %v4042_v3 }
  0xd1   : > { %2904 = vmatmul.mubr.f32.gmra.mrb[10].mxu1 %v4637_v56 }
  0xd2   : > { %2909 = vmatprep.mubr.f32.mxu1 %v4042_v3 }
  0xd3   : > { %2273 = vmatmul.mubr.f32.gmra.mrb[12].mxu0 %v4661_v32 }
  0xd4   : > { %2278 = vmatprep.mubr.f32.mxu0 %v4042_v3 }
  0xd5   : > { %2911 = vmatmul.mubr.f32.gmra.mrb[12].mxu1 %v4661_v32 }
  0xd6   : > { %2916 = vmatprep.mubr.f32.mxu1 %v4042_v3 }
  0xd7   : > { %2280 = vmatmul.mubr.f32.gmra.mrb[14].mxu0 %v4676_v17 }
  0xd8   : > { %2354 = vmatprep.mubr.f32.mxu0 %v4042_v3 }
  0xd9   : > { %2918 = vmatmul.mubr.f32.gmra.mrb[14].mxu1 %v4676_v17 }
  0xda   : > { %2992 = vmatprep.mubr.f32.mxu1 %v4042_v3 }
  0xdb   : > { %2356 = vmatmul.mubr.f32.vlgmr.msra.gmra.mrb[8].mxu0 %v4608_v39 }
  0xdc   : > { %2361 = vmatprep.mubr.f32.mxu0 %v4042_v3 }
  0xdd   : > { %2994 = vmatmul.mubr.f32.vlgmr.msra.gmra.mrb[8].mxu1 %v4608_v39 }
  0xde   : > { %2999 = vmatprep.mubr.f32.mxu1 %v4042_v3 }
  0xdf   : > { %2363 = vmatmul.mubr.f32.gmra.mrb[10].mxu0 %v4637_v56 }
  0xe0   : > { %2368 = vmatprep.mubr.f32.mxu0 %v4042_v3 }
  0xe1   : > { %3001 = vmatmul.mubr.f32.gmra.mrb[10].mxu1 %v4637_v56 }
  0xe2   : > { %3006 = vmatprep.mubr.f32.mxu1 %v4042_v3 }
  0xe3   : > { %2370 = vmatmul.mubr.f32.gmra.mrb[12].mxu0 %v4661_v32 }
  0xe4   : > { %2375 = vmatprep.mubr.f32.mxu0 %v4042_v3 }
  0xe5   : > { %3008 = vmatmul.mubr.f32.gmra.mrb[12].mxu1 %v4661_v32 }
  0xe6   : > { %3013 = vmatprep.mubr.f32.mxu1 %v4042_v3 }
  0xe7   : > { %2377 = vmatmul.mubr.f32.gmra.mrb[14].mxu0 %v4676_v17 }
  0xe8   : > { %3142 = vmatprep.mubr.f32.mxu0 %v4042_v3 }
  0xe9   : > { %3015 = vmatmul.mubr.f32.gmra.mrb[14].mxu1 %v4676_v17 }
  0xea   : > { %3231 = vmatprep.mubr.f32.mxu1 %v4042_v3 }
 0x14e   : > { %v1051_v48 = vpop.f32.mrb[0].mxu0 }
 0x14f   : > { %v1053_v9 = vpop.f32.mrb[1].mxu0 }
 0x150   : > { %v1689_v63 = vpop.f32.mrb[0].mxu1 }
 0x151   : > { %v1691_v24 = vpop.f32.mrb[1].mxu1 }
 0x152   : > { %v1058_v62 = vpop.f32.mrb[2].mxu0 }
 0x153   : > { %v1060_v27 = vpop.f32.mrb[3].mxu0 }
 0x154   : > { %v1696_v2 = vpop.f32.mrb[2].mxu1 }
 0x155   : > { %v1698_v7 = vpop.f32.mrb[3].mxu1 }
 0x156   : > { %v1065_v38 = vpop.f32.mrb[4].mxu0 }
 0x157   : > { %v1067_v8 = vpop.f32.mrb[5].mxu0 }
 0x158   : > { %v1703_v15 = vpop.f32.mrb[4].mxu1 }
 0x159   : > { %v1705_v22 = vpop.f32.mrb[5].mxu1 }
 0x15a   : > { %v1072_v36 = vpop.f32.mrb[6].mxu0 }
 0x15b   : > { %v1074_v20 = vpop.f32.mrb[7].mxu0 }
 0x15c   : > { %v1710_v19 = vpop.f32.mrb[6].mxu1 }
 0x15d   : > { %v1712_v40 = vpop.f32.mrb[7].mxu1 }
 0x1ae   : > { %v2357_v43 = vpop.f32.mrb[8].mxu0 }
 0x1af   : > { %v3021_v21 = vmul.f32 %v2357_v43, %v1051_v48  ;;  %v2359_v28 = vpop.f32.mrb[9].mxu0  ;;  %v3038_v48 = vld [vmem:[%s4928_s4 + $0x8] sm:$0xff] }
 0x1b0   : > { %v2995_v45 = vpop.f32.mrb[8].mxu1  ;;  %v3022_v30 = vmul.f32 %v2359_v28, %v1053_v9  ;;  %v3040_v9 = vld [vmem:[%s4928_s4 + $0x18] sm:$0xff] }
 0x1b1   : > { %v3023_v29 = vmul.f32 %v2995_v45, %v1689_v63  ;;  %v2997_v31 = vpop.f32.mrb[9].mxu1  ;;  %v3039_v63 = vld [vmem:[%s4928_s4 + $0x10] sm:$0xff] }
 0x1b2   : > { %v3024_v34 = vmul.f32 %v2997_v31, %v1691_v24  ;;  %v2364_v39 = vpop.f32.mrb[10].mxu0  ;;  %v3048_v24 = vpop.permute.xlu0 %3047 }
 0x1b3   : > { %v3025_v42 = vmul.f32 %v2364_v39, %v1058_v62  ;;  %v2366_v46 = vpop.f32.mrb[11].mxu0 }
 0x1b4   : > { %v3002_v44 = vpop.f32.mrb[10].mxu1  ;;  %v3026_v53 = vmul.f32 %v2366_v46, %v1060_v27 }
 0x1b5   : > { %v3027_v49 = vmul.f32 %v3002_v44, %v1696_v2  ;;  %v3004_v54 = vpop.f32.mrb[11].mxu1  ;;  %v3743_v56 = vpack.c.bf16 %v3025_v42, %v3021_v21 }
 0x1b6   : > { %v3028_v57 = vmul.f32 %v3004_v54, %v1698_v7  ;;  %v3741_v59 = vpack.c.bf16 %v3026_v53, %v3022_v30  ;;  %v2371_v60 = vpop.f32.mrb[12].mxu0  ;;  %v3053_v2 = vpop.permute.xlu0 %3052 }
 0x1b7   : > { %v3751_v58 = vpack.c.bf16 %v3027_v49, %v3023_v29  ;;  %v3029_v10 = vmul.f32 %v2371_v60, %v1065_v38  ;;  %v2373_v32 = vpop.f32.mrb[13].mxu0 }
 0x1b8   : > { %v3749_v26 = vpack.c.bf16 %v3028_v57, %v3024_v34  ;;  %v3009_v55 = vpop.f32.mrb[12].mxu1  ;;  %v3030_v47 = vmul.f32 %v2373_v32, %v1067_v8  ;;  %3742 = vmatprep.subr.bf16.mxu0 %v3741_v59 }
 0x1b9   : > { %v3031_v41 = vmul.f32 %v3009_v55, %v1703_v15  ;;  %v3011_v33 = vpop.f32.mrb[13].mxu1  ;;  %3744 = vmatpush1.bf16.msra.mxu0 %v3743_v56 }
 0x1ba   : > { %v3032_v51 = vmul.f32 %v3011_v33, %v1705_v22  ;;  %3750 = vmatprep.subr.bf16.mxu1 %v3749_v26  ;;  %v2378_v17 = vpop.f32.mrb[14].mxu0 }
 0x1bb   : > { %3752 = vmatpush1.bf16.msra.mxu1 %v3751_v58  ;;  %v3033_v11 = vmul.f32 %v2378_v17, %v1072_v36  ;;  %v2380_v13 = vpop.f32.mrb[15].mxu0 }
 0x1bc   : > { %v3016_v37 = vpop.f32.mrb[14].mxu1  ;;  %v3034_v12 = vmul.f32 %v2380_v13, %v1074_v20 }
 0x1bd   : > { %v3035_v5 = vmul.f32 %v3016_v37, %v1710_v19  ;;  %v3018_v18 = vpop.f32.mrb[15].mxu1  ;;  %v3747_v61 = vpack.c.bf16 %v3033_v11, %v3029_v10 }
 0x1be   : > { %v3036_v23 = vmul.f32 %v3018_v18, %v1712_v40  ;;  %v3745_v4 = vpack.c.bf16 %v3034_v12, %v3030_v47  ;;  %v3058_v40 = vpop.permute.xlu1 %3057 }
 0x1bf   : > { %v3755_v14 = vpack.c.bf16 %v3035_v5, %v3031_v41 }
 0x1c0   : > { %v3753_v50 = vpack.c.bf16 %v3036_v23, %v3032_v51  ;;  %3746 = vmatprep.subr.bf16.mxu0 %v3745_v4 }
 0x1c1   : > { %3748 = vmatpush1.bf16.msra.mxu0 %v3747_v61 }
 0x1c2   : > { %3754 = vmatprep.subr.bf16.mxu1 %v3753_v50  ;;  %v3063_v60 = vpop.permute.xlu1 %3062 }
 0x1c3   : > { %3756 = vmatpush1.bf16.msra.mxu1 %v3755_v14 }
 0x1c4   : > { %3605 = vmatmul.mubr.msk.f32.vlgmr.msra.gmra.mrb[16].mxu0 %vm3065_vm12, %v3037_v52 }
 0x1c5   : > { %3148 = vmatprep.mubr.f32.mxu0 %v4042_v3 }
 0x1c6   : > { %3609 = vmatmul.mubr.msk.f32.vlgmr.msra.gmra.mrb[16].mxu1 %vm3065_vm12, %v3037_v52 }
 0x1c7   : > { %3237 = vmatprep.mubr.f32.mxu1 %v4042_v3 }
 0x1c8   : > { %3606 = vmatmul.mubr.msk.f32.gmra.mrb[18].mxu0 %vm3065_vm12, %v3038_v48 }
 0x1c9   : > { %3154 = vmatprep.mubr.f32.mxu0 %v4042_v3 }
 0x1ca   : > { %3610 = vmatmul.mubr.msk.f32.gmra.mrb[18].mxu1 %vm3065_vm12, %v3038_v48  ;;  %v3272_v48 = vld [vmem:[%s4930_s6] sm:$0x1] }
 0x1cb   : > { %3243 = vmatprep.mubr.f32.mxu1 %v4042_v3 }
 0x1cc   : > { %3607 = vmatmul.mubr.msk.f32.gmra.mrb[20].mxu0 %vm3065_vm12, %v3039_v63 }
 0x1cd   : > { %3160 = vmatprep.mubr.f32.mxu0 %v4042_v3 }
 0x1ce   : > { %3611 = vmatmul.mubr.msk.f32.gmra.mrb[20].mxu1 %vm3065_vm12, %v3039_v63  ;;  %v4045_v63 = vmov 1966171168  }
 0x1cf   : > { %3249 = vmatprep.mubr.f32.mxu1 %v4042_v3 }
 0x1d0   : > { %3608 = vmatmul.mubr.msk.f32.gmra.mrb[22].mxu0 %vm3065_vm12, %v3040_v9 }
 0x1d1   : > { %3342 = vmatprep.mubr.f32.mxu0 %v4042_v3 }
 0x1d2   : > { %3612 = vmatmul.mubr.msk.f32.gmra.mrb[22].mxu1 %vm3065_vm12, %v3040_v9  ;;  %v3427_v9 = vunpack.c.l.s4 %v4045_v63 }
 0x1d3   : > { %3413 = vmatprep.mubr.f32.mxu1 %v4042_v3 }
 0x297   : > { %v3144_v35 = vpop.f32.mrb[16].mxu0 }
 0x298   : > { %v3146_v62 = vpop.f32.mrb[17].mxu0  ;;  %v3145_v27 = vadd.f32 %v3144_v35, %v3048_v24  ;;  %v3428_v35 = vunpack.c.0.s8 %v3427_v9 }
 0x299   : > { %v3233_v16 = vpop.f32.mrb[16].mxu1  ;;  %v3147_v1 = vadd.f32 %v3146_v62, %v3048_v24 }
 0x29a   : > { %v3235_v25 = vpop.f32.mrb[17].mxu1  ;;  %v3234_v7 = vadd.f32 %v3233_v16, %v3048_v24  ;;  %v3256_v43 = vmax.f32 %v3145_v27, 0.0 }
 0x29b   : > { %v3150_v0 = vpop.f32.mrb[18].mxu0  ;;  %v3236_v38 = vadd.f32 %v3235_v25, %v3048_v24  ;;  %v3257_v28 = vmax.f32 %v3147_v1, 0.0  ;;  %v3274_v24 = vstv %s3273_s14  ;;  %v3431_v1 = vsub.s32 %v3428_v35, %v4159_v6 }
 0x29c   : > { %v3151_v15 = vadd.f32 %v3150_v0, %v3053_v2  ;;  %v3152_v22 = vpop.f32.mrb[19].mxu0  ;;  %v3258_v45 = vmax.f32 %v3234_v7, 0.0 }
 0x29d   : > { %v3239_v8 = vpop.f32.mrb[18].mxu1  ;;  %v3153_v19 = vadd.f32 %v3152_v22, %v3053_v2  ;;  %v3259_v34 = vmax.f32 %v3236_v38, 0.0 }
 0x29e   : > { %v3240_v36 = vadd.f32 %v3239_v8, %v3053_v2  ;;  %v3241_v20 = vpop.f32.mrb[19].mxu1  ;;  %v3260_v3 = vmax.f32 %v3151_v15, 0.0 }
 0x29f   : > { %v3242_v21 = vadd.f32 %v3241_v20, %v3053_v2  ;;  %v3261_v30 = vmax.f32 %v3153_v19, 0.0  ;;  %v3156_v31 = vpop.f32.mrb[20].mxu0  ;;  %v4981_v20 = vlaneseq }
 0x2a0   : > { %v3262_v29 = vmax.f32 %v3240_v36, 0.0  ;;  %v3759_v39 = vpack.c.bf16 %v3260_v3, %v3256_v43  ;;  %v3158_v46 = vpop.f32.mrb[21].mxu0  ;;  %v3157_v57 = vadd.f32 %v3156_v31, %v3058_v40 }
 0x2a1   : > { %v3263_v42 = vmax.f32 %v3242_v21, 0.0  ;;  %v3245_v44 = vpop.f32.mrb[20].mxu1  ;;  %v3757_v53 = vpack.c.bf16 %v3261_v30, %v3257_v28  ;;  %v3159_v59 = vadd.f32 %v3158_v46, %v3058_v40  ;;  %vm3451_vm13 = vcmp.lt.s32.totalorder %v4981_v20, 512 }
 0x2a2   : > { %v3767_v49 = vpack.c.bf16 %v3262_v29, %v3258_v45  ;;  %v3247_v54 = vpop.f32.mrb[21].mxu1  ;;  %v3246_v58 = vadd.f32 %v3245_v44, %v3058_v40  ;;  %v3264_v17 = vmax.f32 %v3157_v57, 0.0 }
 0x2a3   : > { %v3765_v56 = vpack.c.bf16 %v3263_v42, %v3259_v34  ;;  %v3162_v26 = vpop.f32.mrb[22].mxu0  ;;  %3758 = vmatprep.subr.bf16.mxu0 %v3757_v53  ;;  %v3248_v10 = vadd.f32 %v3247_v54, %v3058_v40  ;;  %v3265_v5 = vmax.f32 %v3159_v59, 0.0 }
 0x2a4   : > { %v3163_v55 = vadd.f32 %v3162_v26, %v3063_v60  ;;  %v3164_v41 = vpop.f32.mrb[23].mxu0  ;;  %3760 = vmatpush1.bf16.msra.mxu0 %v3759_v39  ;;  %v3266_v13 = vmax.f32 %v3246_v58, 0.0 }
 0x2a5   : > { %v3251_v32 = vpop.f32.mrb[22].mxu1  ;;  %3766 = vmatprep.subr.bf16.mxu1 %v3765_v56  ;;  %v3165_v33 = vadd.f32 %v3164_v41, %v3063_v60  ;;  %v3267_v61 = vmax.f32 %v3248_v10, 0.0 }
 0x2a6   : > { %v3252_v47 = vadd.f32 %v3251_v32, %v3063_v60  ;;  %v3253_v51 = vpop.f32.mrb[23].mxu1  ;;  %3768 = vmatpush1.bf16.msra.mxu1 %v3767_v49  ;;  %v3268_v11 = vmax.f32 %v3163_v55, 0.0 }
 0x2a7   : > { %v3254_v37 = vadd.f32 %v3253_v51, %v3063_v60  ;;  %v3269_v18 = vmax.f32 %v3165_v33, 0.0 }
 0x2a8   : > { %v3270_v12 = vmax.f32 %v3252_v47, 0.0  ;;  %v3763_v23 = vpack.c.bf16 %v3268_v11, %v3264_v17 }
 0x2a9   : > { %v3271_v14 = vmax.f32 %v3254_v37, 0.0  ;;  %v3761_v50 = vpack.c.bf16 %v3269_v18, %v3265_v5 }
 0x2aa   : > { %v3771_v4 = vpack.c.bf16 %v3270_v12, %v3266_v13 }
 0x2ab   : > { %v3769_v52 = vpack.c.bf16 %v3271_v14, %v3267_v61  ;;  %3762 = vmatprep.subr.bf16.mxu0 %v3761_v50 }
 0x2ac   : > { %3764 = vmatpush1.bf16.msra.mxu0 %v3763_v23 }
 0x2ad   : > { %3770 = vmatprep.subr.bf16.mxu1 %v3769_v52 }
 0x2ae   : > { %3772 = vmatpush1.bf16.msra.mxu1 %v3771_v4 }
 0x2af   : > { %3613 = vmatmul.mubr.msk.f32.vlgmr.msra.gmra.mrb[24].mxu0 %vm3065_vm12, %v3272_v48 }
 0x2b1   : > { %3614 = vmatmul.mubr.msk.f32.vlgmr.msra.gmra.mrb[24].mxu1 %vm3065_vm12, %v3272_v48 }
 0x382   : > { %v3344_v16 = vpop.f32.mrb[24].mxu0 }
 0x383   : > { %v3345_v62 = vadd.f32 %v3344_v16, %v3274_v24  ;;  %v3346_v2 = vpop.f32.mrb[25].mxu0 }
 0x384   : > { %v3415_v25 = vpop.f32.mrb[24].mxu1  ;;  %v3347_v7 = vadd.f32 %v3346_v2, %v3274_v24 }
 0x385   : > { %v3416_v27 = vadd.f32 %v3415_v25, %v3274_v24  ;;  %v3417_v0 = vpop.f32.mrb[25].mxu1 }
 0x386   : > { %v3418_v38 = vadd.f32 %v3417_v0, %v3274_v24  ;;  %v3424_v15 = vcombine.low %v3345_v62, %v3347_v7 }
 0x388   : > { %v3425_v8 = vcombine.low %v3416_v27, %v3418_v38  ;;  %v3432_v22 = vrot.slane %v3424_v15, %v3431_v1 }
 0x38a   : > { %v3439_v36 = vrot.slane %v3425_v8, %v3431_v1 }
 0x38c   : > { %v3440_v19 = vcombine.low %v3432_v22, %v3439_v36 }
 0x38e   : > { %v3447_v40 = vrot.slane %v3440_v19, %v3431_v1 }
 0x390   : > { %3453 = vst.msk [vmem:[%s312_s21] sm:$0xf] %vm3451_vm13, %v3447_v40 }
 0x391   : > { %3991 = shalt.err (!%p3988_p3)
}
 0x392   : > { %s3992_s13 = scalar_lea.hbm %s4882_s25, 64  ;;  %s3996_s18 = scalar_lea.hbm %s4932_s8, 128 }
 0x393   : > { %p3993_p4 = scmp.ne.s32.totalorder %s4882_s25, %s3992_s13  ;;  %p3997_p9 = scmp.lt.u32.totalorder %s4882_s25, %s4932_s8 }
 0x394   : > { %p3998_p10 = scmp.lt.u32.totalorder %s3996_s18, %s3992_s13  ;;  %p4000_p12 = scmp.lt.u32.totalorder %s3992_s13, %s4882_s25 }
 0x395   : > { %p3994_p7 = pnand %p3993_p4, %p4133_p5 }
 0x396   : > { %p3999_p11 = por %p3998_p10, %p3997_p9 }
 0x397   : > { %p3995_p8 = pneg %p3994_p7 }
 0x398   : > { %p4001_p13 = por %p4000_p12, %p3999_p11 }
 0x39a   : > { %p4002_p0 = pnand %p4001_p13, %p3995_p8 }
 0x39c   : > { %4005 = shalt.err (!%p4002_p0)
}
 0x39d   : > { %3933 = dma.vmem_to_hbm [thread:$0]  (%p4133_p5), %s4884_s22, 64, %s4882_s25, %s3455_s26  }
 0x39e PF: > { %p3939_p1 = scmp.ge.s32.totalorder %s4040_s10, 2  ;;  %s3481_s23 = sand.u32 1, %s4028_s29  }
 0x39f   : > { %s3482_s24 = scalar_lea.sflag [#allocation4], %s3481_s23 }
 0x3a0   : > { %p3936_p2 = pnand %p3939_p1, %p4137_p6 }
 0x3a2   : > { %4023 = dma.done.wait (!%p3936_p2), %s3482_s24, 64  }
 0x3a3   : > { %4025 = vsyncadd (!%p3936_p2), %s3482_s24, 4294967232  ;;  %p19_p3 = scmp.ge.s32.totalorder %s4120_s12, 4   ;;  %s4982_s29 = smov %s4032_s30 }
 0x3a4   : > { %s4983_s30 = smov %s4036_s9  ;;  %s4984_s9 = smov %s4131_s15 }
 0x3a5   : > { %s4985_s10 = smov %s4120_s12  ;;  %21 = sbr.rel (!%p19_p3) target bundleno = 5 (0x5), region = 90 }
 0x3ac   :  { %3487 = vsyncpa [#allocation4], 1 }
 0x3ad   :  { %3489 = vsyncpa [#allocation4 + $0x1], 1 }

</bundles_post_ra>
